<compile_context>
chip_gen: v6e
topology: v6e:2x2x1
jax: 0.10.0
libtpu: 0.0.40
codegen_flags: <defaults>
</compile_context>

<pallas_src>
import numpy as np
import jax
import jax.numpy as jnp
from jax import lax
from jax.experimental import pallas as pl
from jax.experimental.pallas import tpu as pltpu

# ---- module hyper-parameters (match the PyTorch globals) ----
BATCH = 1
EMBED = 4
HOPS = 2
MEMORY = 10
VOCAB = 4
QLEN = 6            # query length in words
SLEN = 6            # evidence sentence length in words
NTAB = HOPS + 1     # embedding tables: A, C0, C1   (A_{i+1} = C_i)
SV = SLEN * VOCAB   # 24  : flattened (word, vocab) axis per memory slot
NE = NTAB * EMBED   # 12  : concatenated table width

# constants-slab row layout (sublane-aligned starts: 0, 24, 32)
AQ_ROW = SV              # 24  : PE-folded A table for the query
W_ROW = AQ_ROW + 8       # 32  : final projection W
CONST_ROWS = W_ROW + 8   # 40


def position_encoding(embed_size: int, query_size: int) -> np.ndarray:
    """Exact replica of MemN2N.get_position_encoding -> (query_size, embed_size)."""
    encoding = np.ones((embed_size, query_size), dtype=np.float32)
    ls = query_size + 1
    le = embed_size + 1
    for i in range(1, le):
        for j in range(1, ls):
            encoding[i - 1, j - 1] = (i - (le - 1) / 2) * (j - (ls - 1) / 2)
    encoding = 1 + 4 * encoding / embed_size / query_size
    return np.transpose(encoding).astype(np.float32)


def memn2n_kernel(story_ref, qbow_ref, consts_ref, out_ref):
    story = story_ref[...]          # (MEMORY, SV)      flattened one-hot story
    q_bow = qbow_ref[...]           # (1, VOCAB)        query bag-of-words counts
    consts = consts_ref[...]        # (CONST_ROWS, NE)  [tab_pe ; A*pe_q ; W]

    tab_pe = consts[0:SV, :]                              # (SV, NE)
    a_q = consts[AQ_ROW:AQ_ROW + VOCAB, 0:EMBED]          # (VOCAB, EMBED)
    w_mat = consts[W_ROW:W_ROW + EMBED, 0:VOCAB]          # (EMBED, VOCAB)

    # --- fused story embedding: PE-weighting + per-slot word sum in ONE matmul ---
    mems = jnp.dot(story, tab_pe, preferred_element_type=jnp.float32)   # (MEMORY, 3E)

    # --- query embedding: bag-of-words @ (A with query-PE folded in) -> u0 ---
    u = jnp.dot(q_bow, a_q, preferred_element_type=jnp.float32)         # (1, EMBED)

    # --- hops (fully serial tiny chain; MXU dots, exp on EUP) ---
    for i in range(HOPS):
        mem_a = mems[:, i * EMBED:(i + 1) * EMBED]        # A_i   (MEMORY, EMBED)
        mem_c = mems[:, (i + 1) * EMBED:(i + 2) * EMBED]  # C_i
        # attention: contract last dims directly (no transpose of mem_a)
        logits = lax.dot_general(u, mem_a, (((1,), (1,)), ((), ())),
                                 preferred_element_type=jnp.float32)    # (1, MEMORY)
        logits = logits - jnp.max(logits, axis=-1, keepdims=True)
        pexp = jnp.exp(logits)
        inv = pl.reciprocal(jnp.sum(pexp, axis=-1, keepdims=True), approx=True)
        p = pexp * inv
        # output read + residual
        o = jnp.dot(p, mem_c, preferred_element_type=jnp.float32)       # (1, EMBED)
        u = o + u

    # --- final projection + (exact) softmax ---
    wx = jnp.dot(u, w_mat, preferred_element_type=jnp.float32)          # (1, VOCAB)
    wx = wx - jnp.max(wx, axis=-1, keepdims=True)
    ex = jnp.exp(wx)
    out_ref[...] = ex / jnp.sum(ex, axis=-1, keepdims=True)


def memn2n_forward(x_e, x_q, emb_a, emb_c0, emb_c1, w):
    # --- per-batch data: one-hot story (flattened) and query bag-of-words ---
    q_tok = jnp.squeeze(x_q, axis=1)                                # (B, QLEN)
    q_oh = jax.nn.one_hot(q_tok, VOCAB, dtype=jnp.float32)          # (B, QLEN, V)
    q_bow = jnp.sum(q_oh, axis=1, keepdims=True)                    # (B, 1, V)

    e_oh = jax.nn.one_hot(x_e, VOCAB, dtype=jnp.float32)            # (B, M, S, V)
    story_mat = e_oh.reshape(BATCH, MEMORY, SV)                     # (B, M, 24)

    # --- constants slab: [tab_pe ; A*pe_q ; W], sublane-aligned row blocks ---
    pe_s = position_encoding(EMBED, SLEN)                           # (SLEN, EMBED) np
    pe_q = jnp.asarray(position_encoding(EMBED, BATCH))             # (1, EMBED)  (module: PE over batch)
    tab_cat = jnp.concatenate([emb_a, emb_c0, emb_c1], axis=1)      # (V, 3E)
    pe_tile = jnp.asarray(np.tile(pe_s, (1, NTAB)))                 # (SLEN, 3E)
    # tab_pe[w*V + v, t*E + e] = tab[v, t*E + e] * pe_s[w, e]
    tab_pe = (pe_tile[:, None, :] * tab_cat[None, :, :]).reshape(SV, NE)
    a_q = emb_a * pe_q                                              # (V, E) query PE folded in

    consts = jnp.zeros((CONST_ROWS, NE), dtype=jnp.float32)
    consts = consts.at[0:SV, :].set(tab_pe)
    consts = consts.at[AQ_ROW:AQ_ROW + VOCAB, 0:EMBED].set(a_q)
    consts = consts.at[W_ROW:W_ROW + EMBED, 0:VOCAB].set(w)

    grid = (BATCH,)
    return pl.pallas_call(
        memn2n_kernel,
        out_shape=jax.ShapeDtypeStruct((BATCH, VOCAB), jnp.float32),
        grid=grid,
        in_specs=[
            # batch dim squeezed out -> kernel sees contiguous 2-D slabs
            pl.BlockSpec((None, MEMORY, SV), lambda b: (b, 0, 0)),
            pl.BlockSpec((None, 1, VOCAB), lambda b: (b, 0, 0)),
            pl.BlockSpec((CONST_ROWS, NE), lambda b: (0, 0)),
        ],
        out_specs=pl.BlockSpec((1, VOCAB), lambda b: (b, 0)),
        compiler_params=pltpu.CompilerParams(dimension_semantics=("parallel",)),
    )(story_mat, q_bow, consts)


def memn2n_reference(x_e, x_q, emb_a, emb_c0, emb_c1, w):
    """Pure-JAX reference of the same (intended) forward, for verification."""
    pe_q = jnp.asarray(position_encoding(EMBED, BATCH))
    pe_s = jnp.asarray(position_encoding(EMBED, SLEN))
    tabs = [emb_a, emb_c0, emb_c1]
    q_tok = jnp.squeeze(x_q, axis=1)
    outs = []
    for b in range(BATCH):
        u = jnp.sum(tabs[0][q_tok[b]] * pe_q, axis=0, keepdims=True)        # (1, EMBED)
        for i in range(HOPS):
            mem_a = jnp.sum(tabs[i][x_e[b]] * pe_s[None, :, :], axis=1)     # (MEMORY, EMBED)
            mem_c = jnp.sum(tabs[i + 1][x_e[b]] * pe_s[None, :, :], axis=1)
            p = jax.nn.softmax(u @ mem_a.T, axis=-1)
            u = p @ mem_c + u
        outs.append(jax.nn.softmax(u @ w, axis=-1)[0])
    return jnp.stack(outs)


if __name__ == "__main__":
    key = jax.random.PRNGKey(0)
    k1, k2, k3, k4, k5, k6 = jax.random.split(key, 6)

    # Deterministic parameter init (shapes from __init__): N(0, 0.1) embeddings, randn W.
    emb_a = 0.1 * jax.random.normal(k1, (VOCAB, EMBED), dtype=jnp.float32)
    emb_c0 = 0.1 * jax.random.normal(k2, (VOCAB, EMBED), dtype=jnp.float32)
    emb_c1 = 0.1 * jax.random.normal(k3, (VOCAB, EMBED), dtype=jnp.float32)
    w = jax.random.normal(k4, (EMBED, VOCAB), dtype=jnp.float32)

    # Inputs: token ids in [0, VOCAB)
    x_e = jax.random.randint(k5, (BATCH, MEMORY, SLEN), 0, VOCAB, dtype=jnp.int32)
    x_q = jax.random.randint(k6, (BATCH, 1, QLEN), 0, VOCAB, dtype=jnp.int32)

    y = memn2n_forward(x_e, x_q, emb_a, emb_c0, emb_c1, w)
    jax.block_until_ready(y)

    y_ref = memn2n_reference(x_e, x_q, emb_a, emb_c0, emb_c1, w)
    # Tolerance 1e-3: the attention softmax uses pl.reciprocal(approx=True)
    # (EUP), which introduces ~1e-4 relative error; the final softmax keeps an
    # exact divide.
    np.testing.assert_allclose(np.asarray(y), np.asarray(y_ref), rtol=1e-3, atol=1e-3)

    print("KERNEL_OK")
</pallas_src>

<mosaic_0001>
module attributes {stable_mosaic.version = 11 : i64} {
  func.func @memn2n_kernel(%arg0: i32, %arg1: memref<1x10x24xf32, #tpu.memory_space<vmem>>, %arg2: memref<1x1x4xf32, #tpu.memory_space<vmem>>, %arg3: memref<40x12xf32, #tpu.memory_space<vmem>>, %arg4: memref<1x4xf32, #tpu.memory_space<vmem>>) attributes {dimension_semantics = [#tpu.dimension_semantics<parallel>], iteration_bounds = array<i64: 1>, scalar_prefetch = 0 : i64, scratch_operands = 0 : i64, tpu.core_type = #tpu.core_type<tc>, window_params = [{transform_indices = @transform_0, window_bounds = array<i64: 1, 10, 24>}, {transform_indices = @transform_1, window_bounds = array<i64: 1, 1, 4>}, {pipeline_mode = #tpu.pipeline_mode<synchronous>, transform_indices = @transform_2, window_bounds = array<i64: 40, 12>}, {transform_indices = @transform_3, window_bounds = array<i64: 1, 4>}]} {
    %c0 = arith.constant 0 : index
    %c0_0 = arith.constant 0 : index
    %c0_1 = arith.constant 0 : index
    %0 = vector.load %arg1[%c0, %c0_0, %c0_1] : memref<1x10x24xf32, #tpu.memory_space<vmem>>, vector<1x10x24xf32>
    %1 = vector.shape_cast %0 : vector<1x10x24xf32> to vector<10x24xf32>
    %c0_2 = arith.constant 0 : index
    %c0_3 = arith.constant 0 : index
    %c0_4 = arith.constant 0 : index
    %2 = vector.load %arg2[%c0_2, %c0_3, %c0_4] : memref<1x1x4xf32, #tpu.memory_space<vmem>>, vector<1x1x4xf32>
    %3 = vector.shape_cast %2 : vector<1x1x4xf32> to vector<1x4xf32>
    %c0_5 = arith.constant 0 : index
    %c0_6 = arith.constant 0 : index
    %4 = vector.load %arg3[%c0_5, %c0_6] : memref<40x12xf32, #tpu.memory_space<vmem>>, vector<40x12xf32>
    %5 = vector.extract_strided_slice %4 {offsets = [0, 0], sizes = [24, 12], strides = [1, 1]} : vector<40x12xf32> to vector<24x12xf32>
    %6 = vector.extract_strided_slice %4 {offsets = [24, 0], sizes = [4, 4], strides = [1, 1]} : vector<40x12xf32> to vector<4x4xf32>
    %7 = vector.extract_strided_slice %4 {offsets = [32, 0], sizes = [4, 4], strides = [1, 1]} : vector<40x12xf32> to vector<4x4xf32>
    %cst = arith.constant dense<0.000000e+00> : vector<10x12xf32>
    %8 = tpu.matmul %1, %5, %cst {dimension_numbers = #tpu.dot_dimension_numbers<[1], [0], [0], [1], [0, 0, 1, 1], [], []>} : vector<10x24xf32>, vector<24x12xf32>, vector<10x12xf32> -> vector<10x12xf32>
    %cst_7 = arith.constant dense<0.000000e+00> : vector<1x4xf32>
    %9 = tpu.matmul %3, %6, %cst_7 {dimension_numbers = #tpu.dot_dimension_numbers<[1], [0], [0], [1], [0, 0, 1, 1], [], []>} : vector<1x4xf32>, vector<4x4xf32>, vector<1x4xf32> -> vector<1x4xf32>
    %10 = vector.extract_strided_slice %8 {offsets = [0, 0], sizes = [10, 4], strides = [1, 1]} : vector<10x12xf32> to vector<10x4xf32>
    %11 = vector.extract_strided_slice %8 {offsets = [0, 4], sizes = [10, 4], strides = [1, 1]} : vector<10x12xf32> to vector<10x4xf32>
    %cst_8 = arith.constant dense<0.000000e+00> : vector<1x10xf32>
    %12 = tpu.matmul %9, %10, %cst_8 {dimension_numbers = #tpu.dot_dimension_numbers<[1], [1], [0], [0], [0, 0, 1, 0], [], []>} : vector<1x4xf32>, vector<10x4xf32>, vector<1x10xf32> -> vector<1x10xf32>
    %cst_9 = arith.constant dense<0xFF800000> : vector<1xf32>
    %13 = vector.multi_reduction <maximumf>, %12, %cst_9 [1] : vector<1x10xf32> to vector<1xf32>
    %14 = vector.shape_cast %13 : vector<1xf32> to vector<1x1xf32>
    %15 = vector.broadcast %14 : vector<1x1xf32> to vector<1x10xf32>
    %16 = arith.subf %12, %15 : vector<1x10xf32>
    %17 = math.exp %16 : vector<1x10xf32>
    %cst_10 = arith.constant dense<0.000000e+00> : vector<1xf32>
    %18 = vector.multi_reduction <add>, %17, %cst_10 [1] : vector<1x10xf32> to vector<1xf32>
    %19 = vector.shape_cast %18 : vector<1xf32> to vector<1x1xf32>
    %20 = tpu.reciprocal %19 {approx = true} : vector<1x1xf32> -> vector<1x1xf32>
    %21 = vector.broadcast %20 : vector<1x1xf32> to vector<1x10xf32>
    %22 = arith.mulf %17, %21 : vector<1x10xf32>
    %cst_11 = arith.constant dense<0.000000e+00> : vector<1x4xf32>
    %23 = tpu.matmul %22, %11, %cst_11 {dimension_numbers = #tpu.dot_dimension_numbers<[1], [0], [0], [1], [0, 0, 1, 1], [], []>} : vector<1x10xf32>, vector<10x4xf32>, vector<1x4xf32> -> vector<1x4xf32>
    %24 = arith.addf %23, %9 : vector<1x4xf32>
    %25 = vector.extract_strided_slice %8 {offsets = [0, 4], sizes = [10, 4], strides = [1, 1]} : vector<10x12xf32> to vector<10x4xf32>
    %26 = vector.extract_strided_slice %8 {offsets = [0, 8], sizes = [10, 4], strides = [1, 1]} : vector<10x12xf32> to vector<10x4xf32>
    %cst_12 = arith.constant dense<0.000000e+00> : vector<1x10xf32>
    %27 = tpu.matmul %24, %25, %cst_12 {dimension_numbers = #tpu.dot_dimension_numbers<[1], [1], [0], [0], [0, 0, 1, 0], [], []>} : vector<1x4xf32>, vector<10x4xf32>, vector<1x10xf32> -> vector<1x10xf32>
    %cst_13 = arith.constant dense<0xFF800000> : vector<1xf32>
    %28 = vector.multi_reduction <maximumf>, %27, %cst_13 [1] : vector<1x10xf32> to vector<1xf32>
    %29 = vector.shape_cast %28 : vector<1xf32> to vector<1x1xf32>
    %30 = vector.broadcast %29 : vector<1x1xf32> to vector<1x10xf32>
    %31 = arith.subf %27, %30 : vector<1x10xf32>
    %32 = math.exp %31 : vector<1x10xf32>
    %cst_14 = arith.constant dense<0.000000e+00> : vector<1xf32>
    %33 = vector.multi_reduction <add>, %32, %cst_14 [1] : vector<1x10xf32> to vector<1xf32>
    %34 = vector.shape_cast %33 : vector<1xf32> to vector<1x1xf32>
    %35 = tpu.reciprocal %34 {approx = true} : vector<1x1xf32> -> vector<1x1xf32>
    %36 = vector.broadcast %35 : vector<1x1xf32> to vector<1x10xf32>
    %37 = arith.mulf %32, %36 : vector<1x10xf32>
    %cst_15 = arith.constant dense<0.000000e+00> : vector<1x4xf32>
    %38 = tpu.matmul %37, %26, %cst_15 {dimension_numbers = #tpu.dot_dimension_numbers<[1], [0], [0], [1], [0, 0, 1, 1], [], []>} : vector<1x10xf32>, vector<10x4xf32>, vector<1x4xf32> -> vector<1x4xf32>
    %39 = arith.addf %38, %24 : vector<1x4xf32>
    %cst_16 = arith.constant dense<0.000000e+00> : vector<1x4xf32>
    %40 = tpu.matmul %39, %7, %cst_16 {dimension_numbers = #tpu.dot_dimension_numbers<[1], [0], [0], [1], [0, 0, 1, 1], [], []>} : vector<1x4xf32>, vector<4x4xf32>, vector<1x4xf32> -> vector<1x4xf32>
    %cst_17 = arith.constant dense<0xFF800000> : vector<1xf32>
    %41 = vector.multi_reduction <maximumf>, %40, %cst_17 [1] : vector<1x4xf32> to vector<1xf32>
    %42 = vector.shape_cast %41 : vector<1xf32> to vector<1x1xf32>
    %43 = vector.broadcast %42 : vector<1x1xf32> to vector<1x4xf32>
    %44 = arith.subf %40, %43 : vector<1x4xf32>
    %45 = math.exp %44 : vector<1x4xf32>
    %cst_18 = arith.constant dense<0.000000e+00> : vector<1xf32>
    %46 = vector.multi_reduction <add>, %45, %cst_18 [1] : vector<1x4xf32> to vector<1xf32>
    %47 = vector.shape_cast %46 : vector<1xf32> to vector<1x1xf32>
    %48 = vector.broadcast %47 : vector<1x1xf32> to vector<1x4xf32>
    %49 = arith.divf %45, %48 : vector<1x4xf32>
    %c0_19 = arith.constant 0 : index
    %c0_20 = arith.constant 0 : index
    %50 = vector.load %arg4[%c0_19, %c0_20] : memref<1x4xf32, #tpu.memory_space<vmem>>, vector<1x4xf32>
    tpu.vector_store %arg4[%c0_19, %c0_20], %49 {strides = array<i32>} : memref<1x4xf32, #tpu.memory_space<vmem>>, vector<1x4xf32>,
    return
  }
  func.func @transform_0(%arg0: i32) -> (i32, i32, i32) {
    %c0_i32 = arith.constant 0 : i32
    %c0_i32_0 = arith.constant 0 : i32
    %c0_i32_1 = arith.constant 0 : i32
    return %arg0, %c0_i32, %c0_i32_0 : i32, i32, i32
  }
  func.func @transform_1(%arg0: i32) -> (i32, i32, i32) {
    %c0_i32 = arith.constant 0 : i32
    %c0_i32_0 = arith.constant 0 : i32
    %c0_i32_1 = arith.constant 0 : i32
    return %arg0, %c0_i32, %c0_i32_0 : i32, i32, i32
  }
  func.func @transform_2(%arg0: i32) -> (i32, i32) {
    %c0_i32 = arith.constant 0 : i32
    %c0_i32_0 = arith.constant 0 : i32
    %c0_i32_1 = arith.constant 0 : i32
    return %c0_i32, %c0_i32_0 : i32, i32
  }
  func.func @transform_3(%arg0: i32) -> (i32, i32) {
    %c0_i32 = arith.constant 0 : i32
    %c0_i32_0 = arith.constant 0 : i32
    return %arg0, %c0_i32 : i32, i32
  }
}

</mosaic_0001>

<bundles_post_ra>
// kernel: tpu_custom_call.1
= control target key start
LH: loop header
LB: loop body
LE: loop exit
PB: predicated region body
PF: predicated region fallthrough
CT: control target
= control target key end

     0   :  { %vm23_vm0 = vcmask 195584   ;;  %vm109_vm1 = vcmask 1043456   ;;  %v750_v3 = vmov 0.0   ;;  %vm105_vm2 = vcmask 31744   ;;  %s847_s0 = inlined_call_operand.vmem [shape: f32[1,10,24], index: 0, kind: input, shape index: {}]   ;;  %s848_s1 = inlined_call_operand.vmem [shape: f32[1,1,4], index: 1, kind: input, shape index: {}]   ;;  %s849_s2 = inlined_call_operand.vmem [shape: f32[40,12], index: 2, kind: input, shape index: {}]   ;;  %s850_s3 = inlined_call_operand.hbm [shape: f32[1,4], index: 3, kind: output, shape index: {}]  }
   0x1   :  { %v20_v0 = vld [vmem:[%s849_s2 + $0x10] sm:$0xff]  ;;  %v19_v1 = vld [vmem:[%s849_s2 + $0x8] sm:$0xff]  ;;  %v15_v2 = vld [vmem:[%s847_s0] sm:$0xff]  ;;  %673 = vmatprep.subr.mxu1 %v750_v3 }
   0x2   :  { %664 = vmatprep.subr.mxu0 %v20_v0  ;;  %v21_v4 = vld [vmem:[%s849_s2 + $0x18] sm:$0xff]  ;;  %v18_v5 = vld [vmem:[%s849_s2] sm:$0xff]  ;;  %670 = vmatprep.mubr.msk.f32.mxu0 %vm23_vm0, %v15_v2 }
   0x3   :  { %665 = vmatpush3.msra.mxu0 %v20_v0  ;;  %v17_v6 = vld [vmem:[%s848_s1] sm:$0x1] }
   0x4   :  { %8 = vsyncpa [#allocation3], 0  ;;  %666 = vmatprep.subr.mxu0 %v19_v1  ;;  %674 = vmatpush3.msk.msra.mxu1 %vm109_vm1, %v21_v4  ;;  %v16_v7 = vld [vmem:[%s847_s0 + $0x8] sm:$0x3]  ;;  %vm751_vm3 = vmmov 0   ;;  %s752_s0 = smov 124  }
   0x5   :  { %667 = vmatpush3.msra.mxu0 %v19_v1  ;;  %675 = vmatprep.mubr.msk.f32.mxu1 %vm751_vm3, %v750_v3  ;;  %vm283_vm4 = vcmask 1041408   ;;  %vm262_vm5 = vcmask 73728   ;;  %vm279_vm6 = vcmask 80896   ;;  %s753_s1 = smov 120   ;;  %v22_v41 = vld [vmem:[%s849_s2 + $0x20] sm:$0xff]  ;;  %vm600_vm7 = vcmask 24576  }
   0x6   :  { %668 = vmatprep.subr.mxu0 %v18_v5  ;;  %676 = vmatmul.mubr.msk.f32.vlgmr.msra.gmra.mxu1 %vm105_vm2, %v17_v6  ;;  %s754_s2 = smov [#allocation2]  }
   0x7   :  { %669 = vmatpush3.msra.mxu0 %v18_v5  ;;  %678 = vmatprep.subr.mxu1 %v750_v3  ;;  %s619_s28 = sshll.u32 %s754_s2, 4  ;;  %s620_s28 = int_to_ptr.vmem [resolvable:$true] %s619_s28 }
   0x8   :  { %671 = vmatmul.mubr.msk.f32.vlgmr.msra.gmra.mxu0 %vm23_vm0, %v16_v7  ;;  %682 = vmatprep.mubr.msk.f32.mxu1 %vm751_vm3, %v750_v3  ;;  %s728_s29 = scalar_lea.vmem %s620_s28, 16  ;;  %s732_s30 = scalar_lea.vmem %s620_s28, 32 }
   0x9   :  { %685 = vmatprep.subr.mxu0 %v750_v3  ;;  %689 = vmatprep.mubr.msk.f32.mxu0 %vm751_vm3, %v750_v3  ;;  %p729_p0 = scmp.ne.s32.totalorder %s620_s28, %s728_s29  ;;  %p733_p1 = scmp.lt.s32.totalorder %s620_s28, %s620_s28 }
   0xa   :  { %p734_p2 = scmp.lt.s32.totalorder %s732_s30, %s728_s29 }
   0xc   :  { %p735_p3 = por %p734_p2, %p733_p1 }
   0xe   :  { %p736_p4 = pnand %p735_p3, %p729_p0 }
  0xc6   :  { %v179_v8 = vpop.f32.mrf.mxu1 }
  0xc8   :  { %v672_v9 = vpop.f32.mrf.mxu0  ;;  %v677_v10 = vpop.f32.mrf.mxu1 }
  0xc9   :  { %276 = vrot.lane.b32.xlu1 %v672_v9, %s752_s0  ;;  %679 = vmatpush3.xpose.msk.msra.mxu1 %vm105_vm2, %v672_v9 }
  0xca   :  { %680 = vmatprep.subr.mxu1 %v750_v3  ;;  %v96_v11 = vpop.f32.mrf.mxu0 }
  0xcd   :  { %274 = vrot.lane.b32.xlu1 %v96_v11, %s752_s0  ;;  %681 = vmatpush3.xpose.msk.msra.mxu1 %vm105_vm2, %v96_v11 }
  0xce   :  { %699 = vmatprep.subr.mxu1 %v750_v3 }
  0xd0   :  { %683 = vmatmul.mubr.msk.f32.vlgmr.msra.gmra.mxu1 %vm105_vm2, %v179_v8 }
  0xd1   :  { %703 = vmatprep.mubr.msk.f32.mxu1 %vm751_vm3, %v750_v3 }
 0x13b   :  { %v277_v12 = vpop.permute.xlu1 %276 }
 0x13c   :  { %686 = vmatpush3.msk.msra.mxu0 %vm283_vm4, %v277_v12 }
 0x13d   :  { %687 = vmatprep.subr.mxu0 %v750_v3 }
 0x13f   :  { %v275_v13 = vpop.permute.xlu1 %274 }
 0x140   :  { %688 = vmatpush3.msra.mxu0 %v275_v13 }
 0x141   :  { %692 = vmatprep.subr.mxu0 %v750_v3 }
 0x190   :  { %v258_v14 = vpop.f32.mrf.mxu1 }
 0x191   :  { %v263_v15 = vsel %vm262_vm5, %v258_v14, -inf }
 0x192   :  { %264 = vmax.xlane.f32.xlu0 %v263_v15  ;;  %v684_v16 = vpop.f32.mrf.mxu1 }
 0x21b   :  { %v265_v17 = vpop.xlane.xlu0 %264 }
 0x21c   :  { %v266_v18 = vsub.f32 %v258_v14, %v265_v17 }
 0x21e   :  { %v267_v19 = vmul.f32 1.442695, %v266_v18 }
 0x220   :  { %716 = vpow2.f32 %v267_v19 }
 0x22d   :  { %v717_v20 = vpop.eup %716 }
 0x22e   :  { %v269_v21 = vsel %vm262_vm5, %v717_v20, 0.0 }
 0x22f   :  { %270 = vadd.xlane.f32.xlu0 %v269_v21 }
 0x2b8   :  { %v271_v22 = vpop.xlane.xlu0 %270 }
 0x2b9   :  { %718 = vrcp.f32 %v271_v22 }
 0x2c6   :  { %v719_v23 = vpop.eup %718 }
 0x2c7   :  { %v273_v24 = vmul.f32 %v719_v23, %v717_v20 }
 0x2c9   :  { %690 = vmatmul.mubr.msk.f32.vlgmr.msra.gmra.mxu0 %vm279_vm6, %v273_v24 }
 0x2ca   :  { %693 = vmatpush3.xpose.msk.msra.mxu0 %vm105_vm2, %v277_v12  ;;  %696 = vmatprep.mubr.msk.f32.mxu0 %vm751_vm3, %v750_v3 }
 0x2cb   :  { %694 = vmatprep.subr.mxu0 %v750_v3 }
 0x2ce   :  { %695 = vmatpush3.xpose.msk.msra.mxu0 %vm105_vm2, %v275_v13 }
 0x389   :  { %v352_v25 = vpop.f32.mrf.mxu0 }
 0x38a   :  { %v353_v26 = vadd.f32 %v352_v25, %v179_v8 }
 0x38b   :  { %v691_v27 = vpop.f32.mrf.mxu0 }
 0x38c   :  { %697 = vmatmul.mubr.msk.f32.vlgmr.msra.gmra.mxu0 %vm105_vm2, %v353_v26 }
 0x44c   :  { %v429_v28 = vpop.f32.mrf.mxu0 }
 0x44d   :  { %v433_v29 = vsel %vm262_vm5, %v429_v28, -inf }
 0x44e   :  { %434 = vmax.xlane.f32.xlu0 %v433_v29  ;;  %v698_v30 = vpop.f32.mrf.mxu0 }
 0x464   :  { %446 = vrot.lane.b32.xlu0 %v672_v9, %s753_s1 }
 0x468   :  { %444 = vrot.lane.b32.xlu0 %v96_v11, %s753_s1 }
 0x4d7   :  { %v435_v31 = vpop.xlane.xlu0 %434 }
 0x4d8   :  { %v436_v32 = vsub.f32 %v429_v28, %v435_v31 }
 0x4da   :  { %v437_v33 = vmul.f32 1.442695, %v436_v32 }
 0x4db   :  { %v447_v34 = vpop.permute.xlu0 %446 }
 0x4dc   :  { %720 = vpow2.f32 %v437_v33  ;;  %700 = vmatpush3.msk.msra.mxu1 %vm283_vm4, %v447_v34 }
 0x4dd   :  { %701 = vmatprep.subr.mxu1 %v750_v3 }
 0x4df   :  { %v445_v35 = vpop.permute.xlu0 %444 }
 0x4e0   :  { %702 = vmatpush3.msra.mxu1 %v445_v35 }
 0x4e1   :  { %706 = vmatprep.subr.mxu1 %v750_v3 }
 0x4e9   :  { %v721_v36 = vpop.eup %720 }
 0x4ea   :  { %v439_v37 = vsel %vm262_vm5, %v721_v36, 0.0 }
 0x4eb   :  { %440 = vadd.xlane.f32.xlu1 %v439_v37 }
 0x574   :  { %v441_v38 = vpop.xlane.xlu1 %440 }
 0x575   :  { %722 = vrcp.f32 %v441_v38 }
 0x582   :  { %v723_v39 = vpop.eup %722 }
 0x583   :  { %v443_v40 = vmul.f32 %v723_v39, %v721_v36 }
 0x585   :  { %704 = vmatmul.mubr.msk.f32.vlgmr.msra.gmra.mxu1 %vm279_vm6, %v443_v40 }
 0x586   :  { %707 = vmatpush3.msk.msra.mxu1 %vm109_vm1, %v22_v41  ;;  %708 = vmatprep.mubr.msk.f32.mxu1 %vm751_vm3, %v750_v3 }
 0x645   :  { %v520_v42 = vpop.f32.mrf.mxu1 }
 0x646   :  { %v521_v43 = vadd.f32 %v520_v42, %v353_v26 }
 0x647   :  { %v705_v44 = vpop.f32.mrf.mxu1 }
 0x648   :  { %709 = vmatmul.mubr.msk.f32.vlgmr.msra.gmra.mxu1 %vm105_vm2, %v521_v43 }
 0x708   :  { %v596_v45 = vpop.f32.mrf.mxu1 }
 0x709   :  { %v601_v46 = vsel %vm600_vm7, %v596_v45, -inf }
 0x70a   :  { %602 = vmax.xlane.f32.xlu0 %v601_v46  ;;  %v710_v47 = vpop.f32.mrf.mxu1 }
 0x793   :  { %v603_v48 = vpop.xlane.xlu0 %602 }
 0x794   :  { %v604_v49 = vsub.f32 %v596_v45, %v603_v48 }
 0x796   :  { %v605_v50 = vmul.f32 1.442695, %v604_v49 }
 0x798   :  { %724 = vpow2.f32 %v605_v50 }
 0x7a5   :  { %v725_v51 = vpop.eup %724 }
 0x7a6   :  { %v607_v52 = vsel %vm600_vm7, %v725_v51, 0.0 }
 0x7a7   :  { %608 = vadd.xlane.f32.xlu1 %v607_v52 }
 0x830   :  { %v609_v53 = vpop.xlane.xlu1 %608 }
 0x831   :  { %726 = vrcp.f32 %v609_v53 }
 0x83e   :  { %v727_v54 = vpop.eup %726 }
 0x83f   :  { %v611_v55 = vmul.f32 %v727_v54, %v725_v51 }
 0x841   :  { %612 = vst.msk [vmem:[#allocation2] sm:$0x1] %vm600_vm7, %v611_v55 }
 0x842   :  { %739 = shalt.err (!%p736_p4)
}
 0x843   :  { %622 = dma.vmem_to_hbm [thread:$0]  %s620_s28, 16, %s850_s3, [#allocation3]  }
 0x844   :  { %748 = dma.done.wait [#allocation3], 16  }
 0x845   :  { %749 = vsyncadd [#allocation3], 4294967280 }
 0x846   :  { %626 = vsyncpa [#allocation3], 1 }

</bundles_post_ra>
